<compile_context>
chip_gen: v7x
topology: tpu7x:2x2x1
jax: 0.10.0
libtpu: 0.0.40
codegen_flags: <defaults>
</compile_context>

<pallas_src>
import functools

import jax
import jax.numpy as jnp
from jax import lax
from jax.experimental import pallas as pl
from jax.experimental.pallas import tpu as pltpu


def _round_up(x, m):
    return (x + m - 1) // m * m


def _ce_ls_kernel(logits_ref, targets_ref, out_ref, *, epsilon, num_classes, n_actual, tile_n):
    i = pl.program_id(0)

    x = logits_ref[...].astype(jnp.float32)                   # (TILE_N, C)
    tn, c = x.shape

    # Row mask for the (possibly partial) last block — select, not multiply, so that
    # garbage (NaN/Inf) in out-of-bounds rows cannot poison the partial sum.
    row_ids = i * tile_n + lax.broadcasted_iota(jnp.int32, (tn, 1), 0)
    row_valid = row_ids < n_actual                             # (TILE_N, 1) bool

    # Numerically stable log-softmax pieces (reductions along the lane/class axis).
    m = jnp.max(x, axis=1, keepdims=True)                      # (TILE_N, 1)
    shifted = x - m                                            # (TILE_N, C)
    lse = jnp.log(jnp.sum(jnp.exp(shifted), axis=1, keepdims=True))  # (TILE_N, 1)

    # Fused smoothed-target reduction (no one-hot materialization, single row reduce):
    #   row_loss = lse - sum_c( [(1-eps)*1[c==tgt] + eps/C] * shifted_c )
    cls_ids = lax.broadcasted_iota(jnp.int32, (tn, c), 1)      # (TILE_N, C)
    tgt = targets_ref[...]                                     # (TILE_N, 1) int32
    uni = epsilon / num_classes
    w = jnp.where(cls_ids == tgt, (1.0 - epsilon) + uni, uni)  # (TILE_N, C)
    combined = jnp.sum(w * shifted, axis=1, keepdims=True)     # (TILE_N, 1)

    row_loss = lse - combined                                  # (TILE_N, 1)
    partial = jnp.sum(jnp.where(row_valid, row_loss, 0.0))     # scalar (this tile's sum)

    # Lane-dense per-tile partial output (block-independent -> grid axis stays "parallel").
    out_ref[...] = jnp.full(out_ref.shape, partial, dtype=jnp.float32)


def cross_entropy_label_smooth(logits, targets, *, num_classes, epsilon, tile_n=None):
    """logits: (N, C) float (f32 or bf16), targets: (N,) int -> scalar float32 loss."""
    n, c = logits.shape
    assert c == num_classes

    in_itemsize = jnp.dtype(logits.dtype).itemsize
    # bf16 packs two rows per sublane -> keep TILE_N a multiple of 16 for packed dtypes.
    align = 16 if in_itemsize < 4 else 8

    # --- TILE_N from the f32 working set, not the raw input bytes:
    #     per row ~ 2 * C * in_itemsize (double-buffered input) + ~3 * C * 4 (f32 temps).
    #     ~20 MiB working set + 48 MiB scoped limit fits v7x's 64 MiB physical VMEM and
    #     leaves v5e/v6e (128 MiB) plenty of headroom. ---
    if tile_n is None:
        working_set_budget = 20 * 1024 * 1024
        bytes_per_row = c * (2 * in_itemsize + 12)
        tile_n = working_set_budget // max(1, bytes_per_row)
        tile_n = max(align, min(4096, tile_n))
    tile_n = max(align, (tile_n // align) * align)
    tile_n = min(tile_n, _round_up(n, align))

    num_tiles = pl.cdiv(n, tile_n)

    # No padding of the logits (saves a full HBM pass); partial last block is masked
    # inside the kernel.  Targets just need to be (N, 1) int32.
    targets2d = targets.astype(jnp.int32).reshape(n, 1)

    kernel = functools.partial(
        _ce_ls_kernel,
        epsilon=float(epsilon),
        num_classes=int(num_classes),
        n_actual=int(n),
        tile_n=int(tile_n),
    )

    partials = pl.pallas_call(
        kernel,
        out_shape=jax.ShapeDtypeStruct((num_tiles, 8, 128), jnp.float32),
        grid_spec=pltpu.PrefetchScalarGridSpec(
            num_scalar_prefetch=0,
            grid=(num_tiles,),
            in_specs=[
                pl.BlockSpec((tile_n, c), lambda i: (i, 0)),   # logits tile (lane-dense C)
                pl.BlockSpec((tile_n, 1), lambda i: (i, 0)),   # int32 targets tile
            ],
            out_specs=pl.BlockSpec((1, 8, 128), lambda i: (i, 0, 0)),
        ),
        compiler_params=pltpu.CompilerParams(
            dimension_semantics=("parallel",),
            vmem_limit_bytes=48 * 1024 * 1024,
        ),
    )(logits, targets2d)

    # Final reduce + divide by the *true* batch size in the wrapper.
    return jnp.sum(partials[:, 0, 0]) / jnp.float32(n)


def _reference(logits, targets, num_classes, epsilon):
    log_probs = jax.nn.log_softmax(logits.astype(jnp.float32), axis=1)
    onehot = jax.nn.one_hot(targets, num_classes, dtype=jnp.float32)
    t = (1.0 - epsilon) * onehot + epsilon / num_classes
    return jnp.sum(jnp.mean(-t * log_probs, axis=0))


if __name__ == "__main__":
    key = jax.random.PRNGKey(0)
    k1, k2, k3, k4 = jax.random.split(key, 4)
    epsilon = 0.1

    # Case 1: small single-tile problem (batch=8, classes=16), f32 logits.
    num_classes = 16
    batch = 8
    logits = jax.random.normal(k1, (batch, num_classes), dtype=jnp.float32)
    targets = jax.random.randint(k2, (batch,), 0, num_classes, dtype=jnp.int32)
    loss = cross_entropy_label_smooth(
        logits, targets, num_classes=num_classes, epsilon=epsilon
    )
    loss = jax.block_until_ready(loss)
    ref = _reference(logits, targets, num_classes, epsilon)
    assert jnp.allclose(loss, ref, atol=1e-5, rtol=1e-5), (loss, ref)

    # Case 2: multiple tiles + partial last block (batch=100, classes=256), bf16 logits,
    #         no padding -> exercises the in-kernel select masking.
    num_classes2 = 256
    batch2 = 100
    logits2 = jax.random.normal(k3, (batch2, num_classes2), dtype=jnp.bfloat16)
    targets2 = jax.random.randint(k4, (batch2,), 0, num_classes2, dtype=jnp.int32)
    loss2 = cross_entropy_label_smooth(
        logits2, targets2, num_classes=num_classes2, epsilon=epsilon, tile_n=32
    )
    loss2 = jax.block_until_ready(loss2)
    ref2 = _reference(logits2, targets2, num_classes2, epsilon)
    assert jnp.allclose(loss2, ref2, atol=2e-3, rtol=2e-3), (loss2, ref2)

    print("KERNEL_OK")
</pallas_src>

<mosaic_0001>
module attributes {stable_mosaic.version = 11 : i64} {
  func.func @_ce_ls_kernel(%arg0: i32, %arg1: memref<8x16xf32, #tpu.memory_space<vmem>>, %arg2: memref<8x1xi32, #tpu.memory_space<vmem>>, %arg3: memref<1x8x128xf32, #tpu.memory_space<vmem>>) attributes {dimension_semantics = [#tpu.dimension_semantics<parallel>], iteration_bounds = array<i64: 1>, scalar_prefetch = 0 : i64, scratch_operands = 0 : i64, tpu.core_type = #tpu.core_type<tc>, window_params = [{transform_indices = @transform_0, window_bounds = array<i64: 8, 16>}, {transform_indices = @transform_1, window_bounds = array<i64: 8, 1>}, {transform_indices = @transform_2, window_bounds = array<i64: 1, 8, 128>}]} {
    %c0 = arith.constant 0 : index
    %c0_0 = arith.constant 0 : index
    %0 = vector.load %arg1[%c0, %c0_0] : memref<8x16xf32, #tpu.memory_space<vmem>>, vector<8x16xf32>
    %c8_i32 = arith.constant 8 : i32
    %1 = arith.muli %arg0, %c8_i32 : i32
    %2 = tpu.iota {dimensions = array<i32: 0>} : vector<8x1xi32>
    %3 = vector.broadcast %1 : i32 to vector<8x1xi32>
    %4 = arith.addi %3, %2 : vector<8x1xi32>
    %c8_i32_1 = arith.constant 8 : i32
    %5 = vector.broadcast %c8_i32_1 : i32 to vector<8x1xi32>
    %6 = arith.cmpi slt, %4, %5 : vector<8x1xi32>
    %cst = arith.constant dense<0xFF800000> : vector<8xf32>
    %7 = vector.multi_reduction <maximumf>, %0, %cst [1] : vector<8x16xf32> to vector<8xf32>
    %8 = vector.shape_cast %7 : vector<8xf32> to vector<8x1xf32>
    %9 = vector.broadcast %8 : vector<8x1xf32> to vector<8x16xf32>
    %10 = arith.subf %0, %9 : vector<8x16xf32>
    %11 = math.exp %10 : vector<8x16xf32>
    %cst_2 = arith.constant dense<0.000000e+00> : vector<8xf32>
    %12 = vector.multi_reduction <add>, %11, %cst_2 [1] : vector<8x16xf32> to vector<8xf32>
    %13 = vector.shape_cast %12 : vector<8xf32> to vector<8x1xf32>
    %14 = math.log %13 : vector<8x1xf32>
    %15 = tpu.iota {dimensions = array<i32: 1>} : vector<8x16xi32>
    %c0_3 = arith.constant 0 : index
    %c0_4 = arith.constant 0 : index
    %16 = vector.load %arg2[%c0_3, %c0_4] : memref<8x1xi32, #tpu.memory_space<vmem>>, vector<8x1xi32>
    %17 = vector.broadcast %16 : vector<8x1xi32> to vector<8x16xi32>
    %18 = arith.cmpi eq, %15, %17 : vector<8x16xi32>
    %cst_5 = arith.constant 9.062500e-01 : f32
    %cst_6 = arith.constant 6.250000e-03 : f32
    %19 = vector.broadcast %cst_5 : f32 to vector<8x16xf32>
    %20 = vector.broadcast %cst_6 : f32 to vector<8x16xf32>
    %21 = arith.select %18, %19, %20 : vector<8x16xi1>, vector<8x16xf32>
    %22 = arith.mulf %21, %10 : vector<8x16xf32>
    %cst_7 = arith.constant dense<0.000000e+00> : vector<8xf32>
    %23 = vector.multi_reduction <add>, %22, %cst_7 [1] : vector<8x16xf32> to vector<8xf32>
    %24 = vector.shape_cast %23 : vector<8xf32> to vector<8x1xf32>
    %25 = arith.subf %14, %24 : vector<8x1xf32>
    %cst_8 = arith.constant 0.000000e+00 : f32
    %26 = vector.broadcast %cst_8 : f32 to vector<8x1xf32>
    %27 = arith.select %6, %25, %26 : vector<8x1xi1>, vector<8x1xf32>
    %28 = vector.shape_cast %27 : vector<8x1xf32> to vector<1x8x1xf32>
    %cst_9 = arith.constant dense<0.000000e+00> : vector<1xf32>
    %29 = vector.multi_reduction <add>, %28, %cst_9 [1, 2] : vector<1x8x1xf32> to vector<1xf32>
    %30 = vector.shape_cast %29 : vector<1xf32> to vector<1x1x1xf32>
    %31 = vector.extract %30[0, 0, 0] : f32 from vector<1x1x1xf32>
    %32 = vector.broadcast %31 : f32 to vector<1x8x128xf32>
    %c0_10 = arith.constant 0 : index
    %c0_11 = arith.constant 0 : index
    %c0_12 = arith.constant 0 : index
    %33 = vector.load %arg3[%c0_10, %c0_11, %c0_12] : memref<1x8x128xf32, #tpu.memory_space<vmem>>, vector<1x8x128xf32>
    tpu.vector_store %arg3[%c0_10, %c0_11, %c0_12], %32 {strides = array<i32>} : memref<1x8x128xf32, #tpu.memory_space<vmem>>, vector<1x8x128xf32>,
    return
  }
  func.func @transform_0(%arg0: i32) -> (i32, i32) {
    %c0_i32 = arith.constant 0 : i32
    %c0_i32_0 = arith.constant 0 : i32
    return %arg0, %c0_i32 : i32, i32
  }
  func.func @transform_1(%arg0: i32) -> (i32, i32) {
    %c0_i32 = arith.constant 0 : i32
    %c0_i32_0 = arith.constant 0 : i32
    return %arg0, %c0_i32 : i32, i32
  }
  func.func @transform_2(%arg0: i32) -> (i32, i32, i32) {
    %c0_i32 = arith.constant 0 : i32
    %c0_i32_0 = arith.constant 0 : i32
    %c0_i32_1 = arith.constant 0 : i32
    return %arg0, %c0_i32, %c0_i32_0 : i32, i32, i32
  }
}

</mosaic_0001>

<bundles_post_ra>
// kernel: tpu_custom_call.1
= control target key start
LH: loop header
LB: loop body
LE: loop exit
PB: predicated region body
PF: predicated region fallthrough
CT: control target
= control target key end

     0   :  { %vm19_vm0 = vcmask 130048   ;;  %s145_s0 = inlined_call_operand.vmem [shape: f32[8,16], index: 0, kind: input, shape index: {}]   ;;  %s146_s1 = inlined_call_operand.vmem [shape: s32[8,1], index: 1, kind: input, shape index: {}]   ;;  %s147_s2 = inlined_call_operand.hbm [shape: f32[1,8,128], index: 2, kind: output, shape index: {}]  }
   0x1   :  { %v12_v0 = vld [vmem:[%s145_s0] sm:$0xff] }
   0x2   :  { %7 = vsyncpa [#allocation3], 0  ;;  %v20_v1 = vsel %vm19_vm0, %v12_v0, -inf  ;;  %v106_v2 = vmov 0   ;;  %v33_v3 = vld [vmem:[%s146_s1] sm:$0xff]  ;;  %v31_v6 = vlaneseq  ;;  %vm45_vm2 = vcmask 7168  }
   0x3   :  { %77 = vset.pattern.permute.xlu0 %v106_v2  ;;  %v107_v10 = vmov 0.00625   ;;  %s108_s0 = smov [#allocation2]  }
   0x4   :  { %21 = vmax.xlane.f32.xlu0 %v20_v1  ;;  %v32_v8 = vand.u32 127, %v31_v6  ;;  %s64_s1 = sshll.u32 %s108_s0, 4  ;;  %s65_s1 = int_to_ptr.vmem [resolvable:$true] %s64_s1 }
   0x5   :  { %s82_s14 = scalar_lea.vmem %s65_s1, 128  ;;  %p87_p1 = scmp.lt.s32.totalorder %s65_s1, %s65_s1 }
   0x6   :  { %p83_p0 = scmp.ne.s32.totalorder %s65_s1, %s82_s14  ;;  %p88_p2 = scmp.lt.s32.totalorder %s82_s14, %s82_s14 }
   0x8   :  { %p89_p3 = por %p88_p2, %p87_p1 }
   0xa   :  { %p90_p4 = pnand %p89_p3, %p83_p0 }
  0x1a   :  { %35 = vperm.xlu0 %77, %v33_v3  }
  0x91   :  { %v22_v4 = vpop.xlane.xlu0 %21 }
  0x92   :  { %v23_v5 = vsub.f32 %v12_v0, %v22_v4 }
  0x94   :  { %v24_v7 = vmul.f32 1.442695, %v23_v5 }
  0x96   :  { %78 = vpow2.f32 %v24_v7 }
  0x99   :  { %v36_v9 = vpop.permute.xlu0 %35 }
  0x9a   :  { %vm37_vm1 = vcmp.eq.s32.totalorder %v32_v8, %v36_v9 }
  0x9b   :  { %v38_v11 = vsel %vm37_vm1, 0.90625, %v107_v10 }
  0x9c   :  { %v39_v14 = vmul.f32 %v38_v11, %v23_v5 }
  0x9e   :  { %v40_v15 = vsel %vm19_vm0, %v39_v14, 0.0 }
  0xa0   :  { %v79_v12 = vpop.eup %78 }
  0xa1   :  { %v26_v13 = vsel %vm19_vm0, %v79_v12, 0.0 }
  0xa2   :  { %27 = vadd.xlane.f32.xlu1 %v26_v13 }
  0xa6   :  { %41 = vadd.xlane.f32.xlu1 %v40_v15 }
 0x12f   :  { %v28_v16 = vpop.xlane.xlu1 %27 }
 0x130   :  { %80 = vlog2.f32 %v28_v16 }
 0x133   :  { %v42_v19 = vpop.xlane.xlu1 %41 }
 0x13a   :  { %v81_v17 = vpop.eup %80 }
 0x13b   :  { %v30_v18 = vmul.f32 0.6931472, %v81_v17 }
 0x13d   :  { %v43_v20 = vsub.f32 %v30_v18, %v42_v19 }
 0x13f   :  { %v46_v21 = vsel %vm45_vm2, %v43_v20, 0.0 }
 0x140   :  { %47 = vadd.xlane.f32.xlu1 %v46_v21 }
 0x1cd   :  { %v48_v22 = vpop.xlane.xlu1 %47 }
 0x1ce   :  { %v49_v23 = vrot.slane %v48_v22, 4 }
 0x1d0   :  { %v50_v24 = vadd.f32 %v49_v23, %v48_v22 }
 0x1d2   :  { %v51_v25 = vrot.slane %v50_v24, 2 }
 0x1d4   :  { %v52_v26 = vadd.f32 %v51_v25, %v50_v24 }
 0x1d6   :  { %v53_v27 = vrot.slane %v52_v26, 1 }
 0x1d8   :  { %v54_v28 = vadd.f32 %v53_v27, %v52_v26 }
 0x1da   :  { %72 = vpush %v54_v28 }
 0x20b   :  { %s73_s13 = spop %72 }
 0x20c   :  { %v56_v29 = vstv %s73_s13 }
 0x20d   :  { %57 = vst [vmem:[#allocation2] sm:$0xff] %v56_v29 }
 0x20e   :  { %93 = shalt.err (!%p90_p4)
}
 0x20f   :  { %s94_s17 = scalar_lea.hbm %s147_s2, 128 }
 0x210   :  { %p95_p5 = scmp.ne.s32.totalorder %s147_s2, %s94_s17  ;;  %p98_p6 = scmp.lt.u32.totalorder %s94_s17, %s147_s2 }
 0x212   :  { %p100_p7 = pnand %p98_p6, %p95_p5 }
 0x214   :  { %103 = shalt.err (!%p100_p7)
}
 0x215   :  { %67 = dma.vmem_to_hbm [thread:$0]  %s65_s1, 128, %s147_s2, [#allocation3]  }
 0x216   :  { %104 = dma.done.wait [#allocation3], 128  }
 0x217   :  { %105 = vsyncadd [#allocation3], 4294967168 }
 0x218   :  { %71 = vsyncpa [#allocation3], 1 }

</bundles_post_ra>
